<compile_context>
chip_gen: v6e
topology: v6e:2x2x1
jax: 0.10.0
libtpu: 0.0.40
codegen_flags: <defaults>
</compile_context>

<pallas_src>
import functools

import jax
import jax.numpy as jnp
from jax import lax
from jax.experimental import pallas as pl
from jax.experimental.pallas import tpu as pltpu


def _round_up(a: int, b: int) -> int:
    return pl.cdiv(a, b) * b


def make_rbf_kernel(n_kernels: int, pow2_chain: bool):
    """Build the tile kernel.

    Refs (in, out, scratch):
      scales2_ref: SMEM f32[n_kernels]   scales2[k] = -2/(bw*mult[k]), mult increasing
      xr_ref:      VMEM f32[TM, TK]      row block of X        (block (i, k))
      xc_ref:      VMEM f32[TN, TK]      col block of X        (block (j, k))
      hnr_ref:     VMEM f32[TM, 1]       half row squared norms
      hnc_ref:     VMEM f32[1, TN]       half col squared norms
      o_ref:       VMEM f32[TM, TN]      output tile           (block (i, j))
      acc_ref:     VMEM f32[TM, TN]      gram accumulator (scratch, persists over k)
    """

    def kernel(scales2_ref, xr_ref, xc_ref, hnr_ref, hnc_ref, o_ref, acc_ref):
        k = pl.program_id(2)

        @pl.when(k == 0)
        def _():
            acc_ref[...] = jnp.zeros_like(acc_ref)

        # Gram tile on the MXU: (TM, TK) x (TN, TK)^T -> (TM, TN), f32 accumulate.
        acc_ref[...] += lax.dot_general(
            xr_ref[...], xc_ref[...],
            dimension_numbers=(((1,), (1,)), ((), ())),
            preferred_element_type=jnp.float32,
        )

        @pl.when(k == pl.num_programs(2) - 1)
        def _():
            # 0.5*||xi - xj||^2 = 0.5||xi||^2 + 0.5||xj||^2 - <xi, xj>, clamped vs round-off.
            # The factor 2 is folded into scales2, so exp(l2h*scales2[k]) == exp(-L2/(bw*mult[k])).
            l2h = jnp.maximum(hnr_ref[...] + hnc_ref[...] - acc_ref[...], 0.0)

            if pow2_chain:
                # Multiplier ratio exactly 2 => e_{k-1} = e_k ** 2.
                # One EUP exp (largest multiplier = smallest-magnitude exponent),
                # the rest are VPU squarings.
                e = jnp.exp(l2h * scales2_ref[n_kernels - 1])
                total = e
                for _ in range(n_kernels - 1):
                    e = e * e
                    total = total + e
            else:
                # Generic multipliers: one exp per kernel, scalar multiply (no divides).
                total = jnp.exp(l2h * scales2_ref[0])
                for kk in range(1, n_kernels):
                    total = total + jnp.exp(l2h * scales2_ref[kk])

            # Single lane-dense store per output tile.
            o_ref[...] = total.astype(o_ref.dtype)

    return kernel


@functools.partial(jax.jit, static_argnames=("pow2_chain",))
def rbf_forward(x, multipliers, *, pow2_chain: bool = False):
    """x: (N, D) float, multipliers: (n_kernels,) float (increasing) -> (N, N) float32."""
    x = x.astype(jnp.float32)
    n, d = x.shape
    n_kernels = multipliers.shape[0]

    # --- Bandwidth in closed form (exact, O(N*D)), on the unpadded input. ---
    sq_norms = jnp.sum(x * x, axis=-1)                       # (N,)
    col_sums = jnp.sum(x, axis=0)                            # (D,)
    total_l2 = 2.0 * n * jnp.sum(sq_norms) - 2.0 * jnp.dot(col_sums, col_sums)
    bw = total_l2 / float(n * n - n)
    # Fold the -2 of the cdist expansion into the scale constants.
    neg2_inv_scales = (-2.0 / (bw * multipliers.astype(jnp.float32))).astype(jnp.float32)
    half_norms = 0.5 * sq_norms

    # --- Tile selection (output tiles lane-dense & 256-aligned; K decoupled from D). ---
    if n <= 128:
        tm = tn = 128
    elif n >= 2048:
        tm, tn = 512, 256       # bigger row tile halves col-block HBM refetch
    else:
        tm = tn = 256
    n_pad = _round_up(n, tm)    # tm is a multiple of tn

    if d <= 128:
        tk = 128
    elif d <= 512:
        tk = 256
    else:
        tk = 512
    d_pad = _round_up(d, tk)

    # --- Zero-pad (padded rows/cols are sliced off at the end). ---
    x_p = jnp.zeros((n_pad, d_pad), jnp.float32).at[:n, :d].set(x)
    hn_p = jnp.zeros((n_pad,), jnp.float32).at[:n].set(half_norms)
    hn_row = hn_p.reshape(n_pad, 1)
    hn_col = hn_p.reshape(1, n_pad)

    grid = (n_pad // tm, n_pad // tn, d_pad // tk)
    kernel = make_rbf_kernel(n_kernels, pow2_chain)

    out_p = pl.pallas_call(
        kernel,
        out_shape=jax.ShapeDtypeStruct((n_pad, n_pad), jnp.float32),
        grid=grid,
        in_specs=[
            pl.BlockSpec(memory_space=pltpu.MemorySpace.SMEM),            # neg2_inv_scales
            pl.BlockSpec((tm, tk), lambda i, j, k: (i, k)),               # X row block
            pl.BlockSpec((tn, tk), lambda i, j, k: (j, k)),               # X col block
            pl.BlockSpec((tm, 1), lambda i, j, k: (i, 0)),                # half row norms
            pl.BlockSpec((1, tn), lambda i, j, k: (0, j)),                # half col norms
        ],
        out_specs=pl.BlockSpec((tm, tn), lambda i, j, k: (i, j)),
        scratch_shapes=[pltpu.VMEM((tm, tn), jnp.float32)],               # gram accumulator
        compiler_params=pltpu.CompilerParams(
            dimension_semantics=("parallel", "parallel", "arbitrary"),
        ),
    )(neg2_inv_scales, x_p, x_p, hn_row, hn_col)

    return out_p[:n, :n]


def rbf_reference(x, multipliers):
    """Pure-JAX reference mirroring the PyTorch forward."""
    x = x.astype(jnp.float32)
    diff = x[:, None, :] - x[None, :, :]
    l2 = jnp.sum(diff * diff, axis=-1)
    n = x.shape[0]
    bw = jnp.sum(l2) / (n * n - n)
    return jnp.sum(jnp.exp(-l2[None, ...] / (bw * multipliers)[:, None, None]), axis=0)


if __name__ == "__main__":
    # Module hyperparameters (RBF.__init__ defaults).
    n_kernels = 5
    mul_factor = 2.0
    multipliers = (mul_factor ** (jnp.arange(n_kernels) - n_kernels // 2)).astype(jnp.float32)

    key = jax.random.PRNGKey(0)
    k1, k2 = jax.random.split(key)

    # Small deterministic input: N=8 samples, D=32 features (single tile, single K step).
    x_small = jax.random.normal(k1, (8, 32), dtype=jnp.float32)
    ref_small = rbf_reference(x_small, multipliers)

    out_small = jax.block_until_ready(
        rbf_forward(x_small, multipliers, pow2_chain=(mul_factor == 2.0)))
    assert out_small.shape == (8, 8)
    assert jnp.allclose(out_small, ref_small, atol=1e-4, rtol=1e-4), \
        "pow2-chain kernel mismatch vs reference (small)"

    out_small_generic = jax.block_until_ready(
        rbf_forward(x_small, multipliers, pow2_chain=False))
    assert jnp.allclose(out_small_generic, ref_small, atol=1e-4, rtol=1e-4), \
        "generic kernel mismatch vs reference (small)"

    # Slightly larger input to exercise N padding and the K-axis accumulator path
    # (N=200 -> 256-pad, D=300 -> two 256-wide K steps).
    x_med = jax.random.normal(k2, (200, 300), dtype=jnp.float32)
    ref_med = rbf_reference(x_med, multipliers)
    out_med = jax.block_until_ready(
        rbf_forward(x_med, multipliers, pow2_chain=(mul_factor == 2.0)))
    assert out_med.shape == (200, 200)
    assert jnp.allclose(out_med, ref_med, atol=1e-4, rtol=1e-4), \
        "pow2-chain kernel mismatch vs reference (medium, K-tiled)"

    print("KERNEL_OK")
</pallas_src>

<mosaic_0001>
module attributes {stable_mosaic.version = 11 : i64} {
  func.func @kernel(%arg0: i32, %arg1: i32, %arg2: i32, %arg3: memref<5xf32, #tpu.memory_space<smem>>, %arg4: memref<128x128xf32, #tpu.memory_space<vmem>>, %arg5: memref<128x128xf32, #tpu.memory_space<vmem>>, %arg6: memref<128x1xf32, #tpu.memory_space<vmem>>, %arg7: memref<1x128xf32, #tpu.memory_space<vmem>>, %arg8: memref<128x128xf32, #tpu.memory_space<vmem>>, %arg9: memref<128x128xf32, #tpu.memory_space<vmem>>) attributes {dimension_semantics = [#tpu.dimension_semantics<parallel>, #tpu.dimension_semantics<parallel>, #tpu.dimension_semantics<arbitrary>], iteration_bounds = array<i64: 1, 1, 1>, scalar_prefetch = 0 : i64, scratch_operands = 1 : i64, tpu.core_type = #tpu.core_type<tc>, window_params = [{transform_indices = @transform_0, window_bounds = array<i64: 5>}, {transform_indices = @transform_1, window_bounds = array<i64: 128, 128>}, {transform_indices = @transform_2, window_bounds = array<i64: 128, 128>}, {transform_indices = @transform_3, window_bounds = array<i64: 128, 1>}, {transform_indices = @transform_4, window_bounds = array<i64: 1, 128>}, {transform_indices = @transform_5, window_bounds = array<i64: 128, 128>}]} {
    %c0_i32 = arith.constant 0 : i32
    %0 = arith.cmpi eq, %arg2, %c0_i32 : i32
    %1 = arith.extui %0 : i1 to i32
    %c0_i32_0 = arith.constant 0 : i32
    %2 = arith.cmpi ne, %1, %c0_i32_0 : i32
    scf.if %2 {
      %cst_10 = arith.constant 0.000000e+00 : f32
      %12 = vector.broadcast %cst_10 : f32 to vector<128x128xf32>
      %c0_11 = arith.constant 0 : index
      %c0_12 = arith.constant 0 : index
      %13 = vector.load %arg9[%c0_11, %c0_12] : memref<128x128xf32, #tpu.memory_space<vmem>>, vector<128x128xf32>
      tpu.vector_store %arg9[%c0_11, %c0_12], %12 {strides = array<i32>} : memref<128x128xf32, #tpu.memory_space<vmem>>, vector<128x128xf32>,
    } else {
    }
    %c0 = arith.constant 0 : index
    %c0_1 = arith.constant 0 : index
    %3 = vector.load %arg9[%c0, %c0_1] : memref<128x128xf32, #tpu.memory_space<vmem>>, vector<128x128xf32>
    %c0_2 = arith.constant 0 : index
    %c0_3 = arith.constant 0 : index
    %4 = vector.load %arg4[%c0_2, %c0_3] : memref<128x128xf32, #tpu.memory_space<vmem>>, vector<128x128xf32>
    %c0_4 = arith.constant 0 : index
    %c0_5 = arith.constant 0 : index
    %5 = vector.load %arg5[%c0_4, %c0_5] : memref<128x128xf32, #tpu.memory_space<vmem>>, vector<128x128xf32>
    %cst = arith.constant dense<0.000000e+00> : vector<128x128xf32>
    %6 = tpu.matmul %4, %5, %cst {dimension_numbers = #tpu.dot_dimension_numbers<[1], [1], [0], [0], [0, 0, 1, 0], [], []>} : vector<128x128xf32>, vector<128x128xf32>, vector<128x128xf32> -> vector<128x128xf32>
    %7 = arith.addf %3, %6 : vector<128x128xf32>
    %c0_6 = arith.constant 0 : index
    %c0_7 = arith.constant 0 : index
    %8 = vector.load %arg9[%c0_6, %c0_7] : memref<128x128xf32, #tpu.memory_space<vmem>>, vector<128x128xf32>
    tpu.vector_store %arg9[%c0_6, %c0_7], %7 {strides = array<i32>} : memref<128x128xf32, #tpu.memory_space<vmem>>, vector<128x128xf32>,
    %c0_i32_8 = arith.constant 0 : i32
    %9 = arith.cmpi eq, %arg2, %c0_i32_8 : i32
    %10 = arith.extui %9 : i1 to i32
    %c0_i32_9 = arith.constant 0 : i32
    %11 = arith.cmpi ne, %10, %c0_i32_9 : i32
    scf.if %11 {
      %c0_10 = arith.constant 0 : index
      %c0_11 = arith.constant 0 : index
      %12 = vector.load %arg6[%c0_10, %c0_11] : memref<128x1xf32, #tpu.memory_space<vmem>>, vector<128x1xf32>
      %c0_12 = arith.constant 0 : index
      %c0_13 = arith.constant 0 : index
      %13 = vector.load %arg7[%c0_12, %c0_13] : memref<1x128xf32, #tpu.memory_space<vmem>>, vector<1x128xf32>
      %14 = vector.broadcast %12 : vector<128x1xf32> to vector<128x128xf32>
      %15 = vector.broadcast %13 : vector<1x128xf32> to vector<128x128xf32>
      %16 = arith.addf %14, %15 : vector<128x128xf32>
      %c0_14 = arith.constant 0 : index
      %c0_15 = arith.constant 0 : index
      %17 = vector.load %arg9[%c0_14, %c0_15] : memref<128x128xf32, #tpu.memory_space<vmem>>, vector<128x128xf32>
      %18 = arith.subf %16, %17 : vector<128x128xf32>
      %cst_16 = arith.constant 0.000000e+00 : f32
      %19 = vector.broadcast %cst_16 : f32 to vector<128x128xf32>
      %20 = arith.maximumf %18, %19 : vector<128x128xf32>
      %c4 = arith.constant 4 : index
      %21 = memref.load %arg3[%c4] : memref<5xf32, #tpu.memory_space<smem>>
      %22 = vector.broadcast %21 : f32 to vector<128x128xf32>
      %23 = arith.mulf %20, %22 : vector<128x128xf32>
      %24 = math.exp %23 : vector<128x128xf32>
      %25 = arith.mulf %24, %24 : vector<128x128xf32>
      %26 = arith.addf %24, %25 : vector<128x128xf32>
      %27 = arith.mulf %25, %25 : vector<128x128xf32>
      %28 = arith.addf %26, %27 : vector<128x128xf32>
      %29 = arith.mulf %27, %27 : vector<128x128xf32>
      %30 = arith.addf %28, %29 : vector<128x128xf32>
      %31 = arith.mulf %29, %29 : vector<128x128xf32>
      %32 = arith.addf %30, %31 : vector<128x128xf32>
      %c0_17 = arith.constant 0 : index
      %c0_18 = arith.constant 0 : index
      %33 = vector.load %arg8[%c0_17, %c0_18] : memref<128x128xf32, #tpu.memory_space<vmem>>, vector<128x128xf32>
      tpu.vector_store %arg8[%c0_17, %c0_18], %32 {strides = array<i32>} : memref<128x128xf32, #tpu.memory_space<vmem>>, vector<128x128xf32>,
    } else {
    }
    return
  }
  func.func @transform_0(%arg0: i32, %arg1: i32, %arg2: i32) -> i32 {
    %c0_i32 = arith.constant 0 : i32
    %c0_i32_0 = arith.constant 0 : i32
    return %c0_i32 : i32
  }
  func.func @transform_1(%arg0: i32, %arg1: i32, %arg2: i32) -> (i32, i32) {
    %c0_i32 = arith.constant 0 : i32
    return %arg0, %arg2 : i32, i32
  }
  func.func @transform_2(%arg0: i32, %arg1: i32, %arg2: i32) -> (i32, i32) {
    %c0_i32 = arith.constant 0 : i32
    return %arg1, %arg2 : i32, i32
  }
  func.func @transform_3(%arg0: i32, %arg1: i32, %arg2: i32) -> (i32, i32) {
    %c0_i32 = arith.constant 0 : i32
    %c0_i32_0 = arith.constant 0 : i32
    return %arg0, %c0_i32 : i32, i32
  }
  func.func @transform_4(%arg0: i32, %arg1: i32, %arg2: i32) -> (i32, i32) {
    %c0_i32 = arith.constant 0 : i32
    %c0_i32_0 = arith.constant 0 : i32
    return %c0_i32, %arg1 : i32, i32
  }
  func.func @transform_5(%arg0: i32, %arg1: i32, %arg2: i32) -> (i32, i32) {
    %c0_i32 = arith.constant 0 : i32
    return %arg0, %arg1 : i32, i32
  }
}

</mosaic_0001>

<bundles_post_ra>
// kernel: rbf_forward.1
= control target key start
LH: loop header
LB: loop body
LE: loop exit
PB: predicated region body
PF: predicated region fallthrough
CT: control target
= control target key end

     0   :  { %10 = vsyncpa [#allocation4], 0  ;;  %s1097_s0 = inlined_call_operand.vmem [shape: f32[5], index: 0, kind: input, shape index: {}]   ;;  %s1098_s1 = inlined_call_operand.vmem [shape: f32[128,128], index: 1, kind: input, shape index: {}, may-alias: {1,2}]   ;;  %s1099_s2 = inlined_call_operand.vmem [shape: f32[128,128], index: 2, kind: input, shape index: {}, may-alias: {1,2}]   ;;  %s1100_s3 = inlined_call_operand.vmem [shape: f32[128,1], index: 3, kind: input, shape index: {}]   ;;  %s1101_s4 = inlined_call_operand.vmem [shape: f32[1,128], index: 4, kind: input, shape index: {}]   ;;  %s1102_s5 = inlined_call_operand.vmem [shape: f32[128,128], index: 5, kind: output, shape index: {}]  }
   0x1   :  { %s17_s20 = sshll.u32 %s1097_s0, 4  ;;  %s18_s20 = int_to_ptr.vmem [resolvable:$true] %s17_s20 }
   0x2   :  { %s805_s21 = scalar_lea.vmem %s18_s20, 16  ;;  %p810_p1 = scmp.lt.s32.totalorder %s18_s20, %s18_s20 }
   0x3   :  { %p806_p0 = scmp.ne.s32.totalorder %s18_s20, %s805_s21  ;;  %p811_p2 = scmp.lt.s32.totalorder %s805_s21, %s805_s21 }
   0x5   :  { %p812_p3 = por %p811_p2, %p810_p1 }
   0x7   :  { %p813_p4 = pnand %p812_p3, %p806_p0 }
   0x9   :  { %816 = shalt.err (!%p813_p4)
}
   0xa   :  { %s819_s22 = smov [#allocation3]  }
   0xb   :  { %20 = dma.vmem_to_smem %s18_s20, 16, %s819_s22, [#allocation4]  }
   0xc   :  { %817 = dma.done.wait [#allocation4], 16  }
   0xd   :  { %818 = vsyncadd [#allocation4], 4294967280 }
   0xe   :  { %32 = sfence }
   0xf   :  { %v100_v0 = vld [vmem:[%s1099_s2 + $0x78] sm:$0xff]  ;;  %v99_v1 = vld [vmem:[%s1099_s2 + $0x70] sm:$0xff]  ;;  %v98_v2 = vld [vmem:[%s1099_s2 + $0x68] sm:$0xff]  ;;  %v820_v3 = vmov 0   ;;  %s648_s12 = sld [smem:[#allocation3 + $0x4]] }
  0x10   :  { %681 = vmatprep.subr.mxu0 %v100_v0  ;;  %737 = vmatprep.subr.mxu1 %v100_v0  ;;  %v69_v4 = vld [vmem:[%s1098_s1] sm:$0xff]  ;;  %v283_v7 = vld [vmem:[%s1100_s3 + $0x10] sm:$0xff]  ;;  %v96_v9 = vld [vmem:[%s1099_s2 + $0x58] sm:$0xff] }
  0x11   :  { %682 = vmatpush3.xpose.msra.mxu0 %v100_v0  ;;  %753 = vmatpush3.xpose.msra.mxu1 %v100_v0  ;;  %v77_v5 = vld [vmem:[%s1098_s1 + $0x40] sm:$0xff]  ;;  %v284_v10 = vld [vmem:[%s1100_s3 + $0x18] sm:$0xff]  ;;  %v282_v11 = vld [vmem:[%s1100_s3 + $0x8] sm:$0xff] }
  0x12   :  { %683 = vmatprep.subr.mxu0 %v99_v1  ;;  %738 = vmatprep.subr.mxu1 %v99_v1  ;;  %v97_v6 = vld [vmem:[%s1099_s2 + $0x60] sm:$0xff]  ;;  %v95_v12 = vld [vmem:[%s1099_s2 + $0x50] sm:$0xff]  ;;  %v286_v13 = vld [vmem:[%s1100_s3 + $0x28] sm:$0xff] }
  0x13   :  { %772 = vset.pattern.permute.xlu1 %v820_v3  ;;  %771 = vset.pattern.permute.xlu0 %v820_v3  ;;  %v281_v8 = vld [vmem:[%s1100_s3] sm:$0xff]  ;;  %v94_v15 = vld [vmem:[%s1099_s2 + $0x48] sm:$0xff]  ;;  %v288_v16 = vld [vmem:[%s1100_s3 + $0x38] sm:$0xff] }
  0x14   :  { %713 = vmatprep.mubr.f32.mxu0 %v69_v4  ;;  %725 = vmatprep.mubr.f32.mxu1 %v77_v5  ;;  %v285_v14 = vld [vmem:[%s1100_s3 + $0x20] sm:$0xff]  ;;  %v287_v17 = vld [vmem:[%s1100_s3 + $0x30] sm:$0xff]  ;;  %v290_v19 = vld [vmem:[%s1100_s3 + $0x48] sm:$0xff] }
  0x15   :  { %684 = vmatpush3.xpose.msra.mxu0 %v99_v1  ;;  %754 = vmatpush3.xpose.msra.mxu1 %v99_v1  ;;  %v93_v18 = vld [vmem:[%s1099_s2 + $0x40] sm:$0xff]  ;;  %v92_v21 = vld [vmem:[%s1099_s2 + $0x38] sm:$0xff]  ;;  %v291_v23 = vld [vmem:[%s1100_s3 + $0x50] sm:$0xff]  ;;  %v1006_v3 = vstv %s648_s12 }
  0x16   :  { %685 = vmatprep.subr.mxu0 %v98_v2  ;;  %739 = vmatprep.subr.mxu1 %v98_v2  ;;  %v289_v20 = vld [vmem:[%s1100_s3 + $0x40] sm:$0xff]  ;;  %v292_v22 = vld [vmem:[%s1100_s3 + $0x58] sm:$0xff]  ;;  %v91_v24 = vld [vmem:[%s1099_s2 + $0x30] sm:$0xff] }
  0x17   :  { %310 = vperm.xlu1 %772, %v283_v7   ;;  %300 = vperm.xlu0 %771, %v281_v8   ;;  %v294_v25 = vld [vmem:[%s1100_s3 + $0x68] sm:$0xff]  ;;  %v293_v26 = vld [vmem:[%s1100_s3 + $0x60] sm:$0xff]  ;;  %v296_v28 = vld [vmem:[%s1100_s3 + $0x78] sm:$0xff] }
  0x18   :  { %v90_v27 = vld [vmem:[%s1099_s2 + $0x28] sm:$0xff]  ;;  %v295_v29 = vld [vmem:[%s1100_s3 + $0x70] sm:$0xff]  ;;  %v89_v30 = vld [vmem:[%s1099_s2 + $0x20] sm:$0xff] }
  0x19   :  { %686 = vmatpush3.xpose.msra.mxu0 %v98_v2  ;;  %755 = vmatpush3.xpose.msra.mxu1 %v98_v2  ;;  %v88_v31 = vld [vmem:[%s1099_s2 + $0x18] sm:$0xff]  ;;  %v87_v32 = vld [vmem:[%s1099_s2 + $0x10] sm:$0xff]  ;;  %v86_v33 = vld [vmem:[%s1099_s2 + $0x8] sm:$0xff] }
  0x1a   :  { %687 = vmatprep.subr.mxu0 %v97_v6  ;;  %740 = vmatprep.subr.mxu1 %v97_v6  ;;  %v85_v34 = vld [vmem:[%s1099_s2] sm:$0xff]  ;;  %v70_v35 = vld [vmem:[%s1098_s1 + $0x8] sm:$0xff]  ;;  %v71_v37 = vld [vmem:[%s1098_s1 + $0x10] sm:$0xff] }
  0x1b   :  { %315 = vperm.xlu1 %772, %v284_v10   ;;  %305 = vperm.xlu0 %771, %v282_v11   ;;  %v78_v36 = vld [vmem:[%s1098_s1 + $0x48] sm:$0xff]  ;;  %v79_v38 = vld [vmem:[%s1098_s1 + $0x50] sm:$0xff]  ;;  %v72_v39 = vld [vmem:[%s1098_s1 + $0x18] sm:$0xff] }
  0x1c   :  { %v80_v40 = vld [vmem:[%s1098_s1 + $0x58] sm:$0xff]  ;;  %v73_v41 = vld [vmem:[%s1098_s1 + $0x20] sm:$0xff]  ;;  %v74_v43 = vld [vmem:[%s1098_s1 + $0x28] sm:$0xff] }
  0x1d   :  { %688 = vmatpush3.xpose.msra.mxu0 %v97_v6  ;;  %756 = vmatpush3.xpose.msra.mxu1 %v97_v6  ;;  %v81_v42 = vld [vmem:[%s1098_s1 + $0x60] sm:$0xff]  ;;  %v82_v44 = vld [vmem:[%s1098_s1 + $0x68] sm:$0xff]  ;;  %v75_v45 = vld [vmem:[%s1098_s1 + $0x30] sm:$0xff] }
  0x1e   :  { %689 = vmatprep.subr.mxu0 %v96_v9  ;;  %741 = vmatprep.subr.mxu1 %v96_v9  ;;  %v83_v46 = vld [vmem:[%s1098_s1 + $0x70] sm:$0xff]  ;;  %v76_v47 = vld [vmem:[%s1098_s1 + $0x38] sm:$0xff]  ;;  %v1001_v60 = vld [vmem:[%s1101_s4] ss:$0 sm:$0xff] }
  0x1f   :  { %325 = vperm.xlu1 %772, %v286_v13   ;;  %320 = vperm.xlu0 %771, %v285_v14   ;;  %v84_v48 = vld [vmem:[%s1098_s1 + $0x78] sm:$0xff] }
  0x21   :  { %690 = vmatpush3.xpose.msra.mxu0 %v96_v9  ;;  %757 = vmatpush3.xpose.msra.mxu1 %v96_v9 }
  0x22   :  { %691 = vmatprep.subr.mxu0 %v95_v12  ;;  %742 = vmatprep.subr.mxu1 %v95_v12 }
  0x23   :  { %335 = vperm.xlu1 %772, %v288_v16   ;;  %330 = vperm.xlu0 %771, %v287_v17  }
  0x25   :  { %692 = vmatpush3.xpose.msra.mxu0 %v95_v12  ;;  %758 = vmatpush3.xpose.msra.mxu1 %v95_v12 }
  0x26   :  { %693 = vmatprep.subr.mxu0 %v94_v15  ;;  %743 = vmatprep.subr.mxu1 %v94_v15 }
  0x27   :  { %345 = vperm.xlu1 %772, %v290_v19   ;;  %340 = vperm.xlu0 %771, %v289_v20  }
  0x29   :  { %694 = vmatpush3.xpose.msra.mxu0 %v94_v15  ;;  %759 = vmatpush3.xpose.msra.mxu1 %v94_v15 }
  0x2a   :  { %695 = vmatprep.subr.mxu0 %v93_v18  ;;  %744 = vmatprep.subr.mxu1 %v93_v18 }
  0x2b   :  { %355 = vperm.xlu1 %772, %v292_v22   ;;  %350 = vperm.xlu0 %771, %v291_v23  }
  0x2d   :  { %696 = vmatpush3.xpose.msra.mxu0 %v93_v18  ;;  %760 = vmatpush3.xpose.msra.mxu1 %v93_v18 }
  0x2e   :  { %697 = vmatprep.subr.mxu0 %v92_v21  ;;  %745 = vmatprep.subr.mxu1 %v92_v21 }
  0x2f   :  { %365 = vperm.xlu1 %772, %v294_v25   ;;  %360 = vperm.xlu0 %771, %v293_v26  }
  0x31   :  { %698 = vmatpush3.xpose.msra.mxu0 %v92_v21  ;;  %761 = vmatpush3.xpose.msra.mxu1 %v92_v21 }
  0x32   :  { %699 = vmatprep.subr.mxu0 %v91_v24  ;;  %746 = vmatprep.subr.mxu1 %v91_v24 }
  0x33   :  { %375 = vperm.xlu1 %772, %v296_v28   ;;  %370 = vperm.xlu0 %771, %v295_v29  }
  0x35   :  { %700 = vmatpush3.xpose.msra.mxu0 %v91_v24  ;;  %762 = vmatpush3.xpose.msra.mxu1 %v91_v24 }
  0x36   :  { %701 = vmatprep.subr.mxu0 %v90_v27  ;;  %747 = vmatprep.subr.mxu1 %v90_v27 }
  0x39   :  { %702 = vmatpush3.xpose.msra.mxu0 %v90_v27  ;;  %763 = vmatpush3.xpose.msra.mxu1 %v90_v27 }
  0x3a   :  { %703 = vmatprep.subr.mxu0 %v89_v30  ;;  %748 = vmatprep.subr.mxu1 %v89_v30 }
  0x3d   :  { %704 = vmatpush3.xpose.msra.mxu0 %v89_v30  ;;  %764 = vmatpush3.xpose.msra.mxu1 %v89_v30 }
  0x3e   :  { %705 = vmatprep.subr.mxu0 %v88_v31  ;;  %749 = vmatprep.subr.mxu1 %v88_v31 }
  0x41   :  { %706 = vmatpush3.xpose.msra.mxu0 %v88_v31  ;;  %765 = vmatpush3.xpose.msra.mxu1 %v88_v31 }
  0x42   :  { %707 = vmatprep.subr.mxu0 %v87_v32  ;;  %750 = vmatprep.subr.mxu1 %v87_v32 }
  0x45   :  { %708 = vmatpush3.xpose.msra.mxu0 %v87_v32  ;;  %766 = vmatpush3.xpose.msra.mxu1 %v87_v32 }
  0x46   :  { %709 = vmatprep.subr.mxu0 %v86_v33  ;;  %751 = vmatprep.subr.mxu1 %v86_v33 }
  0x49   :  { %710 = vmatpush3.xpose.msra.mxu0 %v86_v33  ;;  %767 = vmatpush3.xpose.msra.mxu1 %v86_v33 }
  0x4a   :  { %711 = vmatprep.subr.mxu0 %v85_v34  ;;  %752 = vmatprep.subr.mxu1 %v85_v34 }
  0x4d   :  { %712 = vmatpush3.xpose.msra.mxu0 %v85_v34  ;;  %768 = vmatpush3.xpose.msra.mxu1 %v85_v34 }
  0x50   :  { %714 = vmatmul.mubr.f32.vlgmr.msra.gmra.mxu0 %v70_v35  ;;  %726 = vmatmul.mubr.f32.vlgmr.msra.gmra.mxu1 %v78_v36 }
  0x51   :  { %716 = vmatprep.mubr.f32.mxu0 %v71_v37  ;;  %728 = vmatprep.mubr.f32.mxu1 %v79_v38 }
  0x54   :  { %717 = vmatmul.mubr.f32.gmra.mxu0 %v72_v39  ;;  %729 = vmatmul.mubr.f32.gmra.mxu1 %v80_v40 }
  0x55   :  { %719 = vmatprep.mubr.f32.mxu0 %v73_v41  ;;  %731 = vmatprep.mubr.f32.mxu1 %v81_v42 }
  0x58   :  { %720 = vmatmul.mubr.f32.gmra.mxu0 %v74_v43  ;;  %732 = vmatmul.mubr.f32.gmra.mxu1 %v82_v44 }
  0x59   :  { %722 = vmatprep.mubr.f32.mxu0 %v75_v45  ;;  %734 = vmatprep.mubr.f32.mxu1 %v83_v46 }
  0x5c   :  { %723 = vmatmul.mubr.f32.gmra.mxu0 %v76_v47  ;;  %735 = vmatmul.mubr.f32.gmra.mxu1 %v84_v48 }
  0x92   :  { %v311_v49 = vpop.permute.xlu1 %310  ;;  %v301_v51 = vpop.permute.xlu0 %300 }
  0x93   :  { %v386_v1 = vadd.f32 %v1001_v60, %v311_v49  ;;  %v384_v5 = vadd.f32 %v1001_v60, %v301_v51 }
  0x96   :  { %v316_v50 = vpop.permute.xlu1 %315  ;;  %v306_v53 = vpop.permute.xlu0 %305 }
  0x97   :  { %v385_v62 = vadd.f32 %v1001_v60, %v306_v53  ;;  %v387_v9 = vadd.f32 %v1001_v60, %v316_v50 }
  0x9a   :  { %v326_v52 = vpop.permute.xlu1 %325  ;;  %v321_v55 = vpop.permute.xlu0 %320 }
  0x9b   :  { %v389_v10 = vadd.f32 %v1001_v60, %v326_v52  ;;  %v1013_v11 = vadd.f32 %v1001_v60, %v321_v55 }
  0x9e   :  { %v336_v54 = vpop.permute.xlu1 %335  ;;  %v331_v57 = vpop.permute.xlu0 %330 }
  0x9f   :  { %v1016_v12 = vadd.f32 %v1001_v60, %v336_v54  ;;  %v1019_v20 = vadd.f32 %v1001_v60, %v331_v57 }
  0xa2   :  { %v346_v56 = vpop.permute.xlu1 %345  ;;  %v341_v59 = vpop.permute.xlu0 %340 }
  0xa3   :  { %v393_v63 = vadd.f32 %v1001_v60, %v346_v56  ;;  %v392_v6 = vadd.f32 %v1001_v60, %v341_v59 }
  0xa6   :  { %v356_v58 = vpop.permute.xlu1 %355  ;;  %v351_v0 = vpop.permute.xlu0 %350 }
  0xa7   :  { %v395_v21 = vadd.f32 %v1001_v60, %v356_v58  ;;  %v394_v22 = vadd.f32 %v1001_v60, %v351_v0 }
  0xaa   :  { %v366_v61 = vpop.permute.xlu1 %365  ;;  %v361_v26 = vpop.permute.xlu0 %360 }
  0xab   :  { %v397_v23 = vadd.f32 %v1001_v60, %v366_v61  ;;  %v396_v31 = vadd.f32 %v1001_v60, %v361_v26 }
  0xae   :  { %v376_v15 = vpop.permute.xlu1 %375  ;;  %v371_v55 = vpop.permute.xlu0 %370 }
  0xaf   :  { %v399_v32 = vadd.f32 %v1001_v60, %v376_v15 }
 0x110   :  { %v715_v2 = vpop.f32.mrf.mxu0  ;;  %v727_v4 = vpop.f32.mrf.mxu1 }
 0x111   :  { %v417_v7 = vsub.f32 %v385_v62, %v715_v2  ;;  %v425_v8 = vsub.f32 %v393_v63, %v727_v4 }
 0x112   :  { %v167_v13 = vpop.f32.mrf.mxu0  ;;  %v207_v14 = vpop.f32.mrf.mxu1 }
 0x113   :  { %v433_v16 = vmax.f32 %v417_v7, 0.0  ;;  %v441_v17 = vmax.f32 %v425_v8, 0.0  ;;  %v416_v18 = vsub.f32 %v384_v5, %v167_v13  ;;  %v424_v19 = vsub.f32 %v392_v6, %v207_v14 }
 0x114   :  { %v718_v24 = vpop.f32.mrf.mxu0  ;;  %v730_v25 = vpop.f32.mrf.mxu1 }
 0x115   :  { %v451_v27 = vmul.f32 %v1006_v3, %v433_v16  ;;  %v459_v28 = vmul.f32 %v1006_v3, %v441_v17  ;;  %v432_v29 = vmax.f32 %v416_v18, 0.0  ;;  %v440_v30 = vmax.f32 %v424_v19, 0.0 }
 0x116   :  { %v419_v33 = vsub.f32 %v387_v9, %v718_v24  ;;  %v427_v34 = vsub.f32 %v395_v21, %v730_v25  ;;  %v177_v35 = vpop.f32.mrf.mxu0  ;;  %v217_v36 = vpop.f32.mrf.mxu1 }
 0x117   :  { %v468_v37 = vmul.f32 1.442695, %v451_v27  ;;  %v484_v38 = vmul.f32 1.442695, %v459_v28  ;;  %v450_v39 = vmul.f32 %v1006_v3, %v432_v29  ;;  %v458_v40 = vmul.f32 %v1006_v3, %v440_v30 }
 0x118   :  { %v435_v41 = vmax.f32 %v419_v33, 0.0  ;;  %v443_v42 = vmax.f32 %v427_v34, 0.0  ;;  %v418_v43 = vsub.f32 %v386_v1, %v177_v35  ;;  %v426_v44 = vsub.f32 %v394_v22, %v217_v36  ;;  %v721_v45 = vpop.f32.mrf.mxu0  ;;  %v733_v46 = vpop.f32.mrf.mxu1 }
 0x119   :  { %773 = vpow2.f32 %v468_v37  ;;  %v466_v47 = vmul.f32 1.442695, %v450_v39  ;;  %v482_v48 = vmul.f32 1.442695, %v458_v40  ;;  %v421_v49 = vsub.f32 %v389_v10, %v721_v45 }
 0x11a   :  { %775 = vpow2.f32 %v484_v38  ;;  %v453_v50 = vmul.f32 %v1006_v3, %v435_v41  ;;  %v461_v51 = vmul.f32 %v1006_v3, %v443_v42  ;;  %v434_v52 = vmax.f32 %v418_v43, 0.0  ;;  %v187_v53 = vpop.f32.mrf.mxu0  ;;  %v227_v54 = vpop.f32.mrf.mxu1 }
 0x11b   :  { %777 = vpow2.f32 %v466_v47  ;;  %v442_v56 = vmax.f32 %v426_v44, 0.0  ;;  %v437_v57 = vmax.f32 %v421_v49, 0.0  ;;  %v429_v58 = vsub.f32 %v397_v23, %v733_v46 }
 0x11c   :  { %779 = vpow2.f32 %v482_v48  ;;  %v472_v59 = vmul.f32 1.442695, %v453_v50  ;;  %v488_v61 = vmul.f32 1.442695, %v461_v51  ;;  %v452_v62 = vmul.f32 %v1006_v3, %v434_v52  ;;  %v724_v63 = vpop.f32.mrf.mxu0  ;;  %v736_v0 = vpop.f32.mrf.mxu1 }
 0x11d   :  { %v460_v1 = vmul.f32 %v1006_v3, %v442_v56  ;;  %v455_v2 = vmul.f32 %v1006_v3, %v437_v57  ;;  %v445_v4 = vmax.f32 %v429_v58, 0.0  ;;  %v420_v5 = vsub.f32 %v1013_v11, %v187_v53 }
 0x11e   :  { %781 = vpow2.f32 %v472_v59  ;;  %v470_v6 = vmul.f32 1.442695, %v452_v62  ;;  %v428_v7 = vsub.f32 %v396_v31, %v227_v54  ;;  %v423_v8 = vsub.f32 %v1016_v12, %v724_v63  ;;  %v197_v9 = vpop.f32.mrf.mxu0  ;;  %v237_v19 = vpop.f32.mrf.mxu1 }
 0x11f   :  { %v398_v10 = vadd.f32 %v1001_v60, %v371_v55  ;;  %783 = vpow2.f32 %v488_v61  ;;  %v486_v13 = vmul.f32 1.442695, %v460_v1  ;;  %v463_v14 = vmul.f32 %v1006_v3, %v445_v4 }
 0x120   :  { %v476_v15 = vmul.f32 1.442695, %v455_v2  ;;  %v436_v16 = vmax.f32 %v420_v5, 0.0  ;;  %v444_v17 = vmax.f32 %v428_v7, 0.0  ;;  %v439_v18 = vmax.f32 %v423_v8, 0.0 }
 0x121   :  { %785 = vpow2.f32 %v470_v6  ;;  %v492_v21 = vmul.f32 1.442695, %v463_v14  ;;  %v431_v11 = vsub.f32 %v399_v32, %v736_v0  ;;  %v422_v22 = vsub.f32 %v1019_v20, %v197_v9 }
 0x122   :  { %787 = vpow2.f32 %v486_v13  ;;  %v454_v12 = vmul.f32 %v1006_v3, %v436_v16  ;;  %v462_v23 = vmul.f32 %v1006_v3, %v444_v17  ;;  %v457_v60 = vmul.f32 %v1006_v3, %v439_v18 }
 0x123   :  { %v447_v24 = vmax.f32 %v431_v11, 0.0  ;;  %v438_v25 = vmax.f32 %v422_v22, 0.0  ;;  %v430_v26 = vsub.f32 %v398_v10, %v237_v19  ;;  %789 = vpow2.f32 %v476_v15 }
 0x124   :  { %v474_v27 = vmul.f32 1.442695, %v454_v12  ;;  %v490_v28 = vmul.f32 1.442695, %v462_v23  ;;  %v480_v29 = vmul.f32 1.442695, %v457_v60  ;;  %791 = vpow2.f32 %v492_v21 }
 0x125   :  { %v465_v30 = vmul.f32 %v1006_v3, %v447_v24  ;;  %v456_v31 = vmul.f32 %v1006_v3, %v438_v25  ;;  %v446_v20 = vmax.f32 %v430_v26, 0.0 }
 0x126   :  { %v774_v32 = vpop.eup %773  ;;  %793 = vpow2.f32 %v474_v27 }
 0x127   :  { %v776_v33 = vpop.eup %775  ;;  %v499_v34 = vmul.f32 %v774_v32, %v774_v32  ;;  %795 = vpow2.f32 %v490_v28  ;;  %v496_v35 = vmul.f32 1.442695, %v465_v30  ;;  %v478_v36 = vmul.f32 1.442695, %v456_v31 }
 0x128   :  { %v778_v37 = vpop.eup %777  ;;  %v507_v38 = vmul.f32 %v776_v33, %v776_v33  ;;  %797 = vpow2.f32 %v480_v29  ;;  %v1046_v39 = vmul.f32 %v1006_v3, %v446_v20 }
 0x129   :  { %v780_v40 = vpop.eup %779  ;;  %v515_v41 = vadd.f32 %v774_v32, %v499_v34  ;;  %v531_v42 = vmul.f32 %v499_v34, %v499_v34  ;;  %v498_v43 = vmul.f32 %v778_v37, %v778_v37  ;;  %799 = vpow2.f32 %v496_v35 }
 0x12a   :  { %v523_v44 = vadd.f32 %v776_v33, %v507_v38  ;;  %v539_v45 = vmul.f32 %v507_v38, %v507_v38  ;;  %v506_v46 = vmul.f32 %v780_v40, %v780_v40  ;;  %801 = vpow2.f32 %v478_v36 }
 0x12b   :  { %v782_v47 = vpop.eup %781  ;;  %v547_v48 = vadd.f32 %v531_v42, %v515_v41  ;;  %v563_v49 = vmul.f32 %v531_v42, %v531_v42  ;;  %v514_v50 = vadd.f32 %v778_v37, %v498_v43  ;;  %v530_v51 = vmul.f32 %v498_v43, %v498_v43 }
 0x12c   :  { %v784_v52 = vpop.eup %783  ;;  %v555_v53 = vadd.f32 %v539_v45, %v523_v44  ;;  %v571_v54 = vmul.f32 %v539_v45, %v539_v45  ;;  %v522_v55 = vadd.f32 %v780_v40, %v506_v46  ;;  %v538_v3 = vmul.f32 %v506_v46, %v506_v46 }
 0x12d   :  { %v579_v56 = vadd.f32 %v563_v49, %v547_v48  ;;  %v595_v57 = vmul.f32 %v563_v49, %v563_v49  ;;  %v546_v58 = vadd.f32 %v530_v51, %v514_v50  ;;  %v562_v59 = vmul.f32 %v530_v51, %v530_v51 }
 0x12e   :  { %v786_v61 = vpop.eup %785  ;;  %v587_v62 = vadd.f32 %v571_v54, %v555_v53  ;;  %v603_v63 = vmul.f32 %v571_v54, %v571_v54  ;;  %v554_v0 = vadd.f32 %v538_v3, %v522_v55  ;;  %v570_v1 = vmul.f32 %v538_v3, %v538_v3 }
 0x12f   :  { %v788_v2 = vpop.eup %787  ;;  %v611_v4 = vadd.f32 %v595_v57, %v579_v56  ;;  %v578_v5 = vadd.f32 %v562_v59, %v546_v58  ;;  %v594_v6 = vmul.f32 %v562_v59, %v562_v59  ;;  %v501_v7 = vmul.f32 %v782_v47, %v782_v47 }
 0x130   :  { %v619_v8 = vadd.f32 %v603_v63, %v587_v62  ;;  %v586_v9 = vadd.f32 %v570_v1, %v554_v0  ;;  %v602_v10 = vmul.f32 %v570_v1, %v570_v1  ;;  %v509_v13 = vmul.f32 %v784_v52, %v784_v52  ;;  %v790_v14 = vpop.eup %789 }
 0x131   :  { %627 = vst [vmem:[%s1102_s5 + $0x8] sm:$0xff] %v611_v4  ;;  %v610_v15 = vadd.f32 %v594_v6, %v578_v5  ;;  %v517_v16 = vadd.f32 %v782_v47, %v501_v7  ;;  %v533_v17 = vmul.f32 %v501_v7, %v501_v7  ;;  %v500_v18 = vmul.f32 %v786_v61, %v786_v61  ;;  %v792_v19 = vpop.eup %791 }
 0x132   :  { %635 = vst [vmem:[%s1102_s5 + $0x48] sm:$0xff] %v619_v8  ;;  %v618_v21 = vadd.f32 %v602_v10, %v586_v9  ;;  %v525_v11 = vadd.f32 %v784_v52, %v509_v13  ;;  %v541_v22 = vmul.f32 %v509_v13, %v509_v13  ;;  %v508_v12 = vmul.f32 %v788_v2, %v788_v2 }
 0x133   :  { %v794_v23 = vpop.eup %793  ;;  %626 = vst [vmem:[%s1102_s5] sm:$0xff] %v610_v15  ;;  %v549_v60 = vadd.f32 %v533_v17, %v517_v16  ;;  %v565_v24 = vmul.f32 %v533_v17, %v533_v17  ;;  %v516_v25 = vadd.f32 %v786_v61, %v500_v18  ;;  %v532_v26 = vmul.f32 %v500_v18, %v500_v18 }
 0x134   :  { %v796_v27 = vpop.eup %795  ;;  %634 = vst [vmem:[%s1102_s5 + $0x40] sm:$0xff] %v618_v21  ;;  %v557_v28 = vadd.f32 %v541_v22, %v525_v11  ;;  %v573_v29 = vmul.f32 %v541_v22, %v541_v22  ;;  %v524_v30 = vadd.f32 %v788_v2, %v508_v12  ;;  %v540_v31 = vmul.f32 %v508_v12, %v508_v12 }
 0x135   :  { %v798_v20 = vpop.eup %797  ;;  %v581_v32 = vadd.f32 %v565_v24, %v549_v60  ;;  %v597_v33 = vmul.f32 %v565_v24, %v565_v24  ;;  %v548_v34 = vadd.f32 %v532_v26, %v516_v25  ;;  %v564_v35 = vmul.f32 %v532_v26, %v532_v26 }
 0x136   :  { %v800_v36 = vpop.eup %799  ;;  %v589_v37 = vadd.f32 %v573_v29, %v557_v28  ;;  %v605_v38 = vmul.f32 %v573_v29, %v573_v29  ;;  %v556_v40 = vadd.f32 %v540_v31, %v524_v30  ;;  %v572_v41 = vmul.f32 %v540_v31, %v540_v31 }
 0x137   :  { %v802_v42 = vpop.eup %801  ;;  %v613_v43 = vadd.f32 %v597_v33, %v581_v32  ;;  %v580_v44 = vadd.f32 %v564_v35, %v548_v34  ;;  %v596_v45 = vmul.f32 %v564_v35, %v564_v35  ;;  %v503_v46 = vmul.f32 %v790_v14, %v790_v14 }
 0x138   :  { %v621_v47 = vadd.f32 %v605_v38, %v589_v37  ;;  %v588_v48 = vadd.f32 %v572_v41, %v556_v40  ;;  %v604_v49 = vmul.f32 %v572_v41, %v572_v41  ;;  %v511_v50 = vmul.f32 %v792_v19, %v792_v19 }
 0x139   :  { %629 = vst [vmem:[%s1102_s5 + $0x18] sm:$0xff] %v613_v43  ;;  %v612_v51 = vadd.f32 %v596_v45, %v580_v44  ;;  %v519_v52 = vadd.f32 %v790_v14, %v503_v46  ;;  %v535_v53 = vmul.f32 %v503_v46, %v503_v46  ;;  %v502_v54 = vmul.f32 %v794_v23, %v794_v23 }
 0x13a   :  { %637 = vst [vmem:[%s1102_s5 + $0x58] sm:$0xff] %v621_v47  ;;  %v620_v55 = vadd.f32 %v604_v49, %v588_v48  ;;  %v527_v3 = vadd.f32 %v792_v19, %v511_v50  ;;  %v543_v56 = vmul.f32 %v511_v50, %v511_v50  ;;  %v510_v57 = vmul.f32 %v796_v27, %v796_v27 }
 0x13b   :  { %628 = vst [vmem:[%s1102_s5 + $0x10] sm:$0xff] %v612_v51  ;;  %v551_v58 = vadd.f32 %v535_v53, %v519_v52  ;;  %v567_v59 = vmul.f32 %v535_v53, %v535_v53  ;;  %v518_v61 = vadd.f32 %v794_v23, %v502_v54  ;;  %v534_v62 = vmul.f32 %v502_v54, %v502_v54 }
 0x13c   :  { %636 = vst [vmem:[%s1102_s5 + $0x50] sm:$0xff] %v620_v55  ;;  %v559_v63 = vadd.f32 %v543_v56, %v527_v3  ;;  %v575_v0 = vmul.f32 %v543_v56, %v543_v56  ;;  %v526_v1 = vadd.f32 %v796_v27, %v510_v57  ;;  %v542_v2 = vmul.f32 %v510_v57, %v510_v57 }
 0x13d   :  { %v583_v4 = vadd.f32 %v567_v59, %v551_v58  ;;  %v599_v5 = vmul.f32 %v567_v59, %v567_v59  ;;  %v550_v6 = vadd.f32 %v534_v62, %v518_v61  ;;  %v566_v7 = vmul.f32 %v534_v62, %v534_v62 }
 0x13e   :  { %v591_v8 = vadd.f32 %v575_v0, %v559_v63  ;;  %v607_v9 = vmul.f32 %v575_v0, %v575_v0  ;;  %v558_v10 = vadd.f32 %v542_v2, %v526_v1  ;;  %v574_v13 = vmul.f32 %v542_v2, %v542_v2 }
 0x13f   :  { %v615_v14 = vadd.f32 %v599_v5, %v583_v4  ;;  %v582_v15 = vadd.f32 %v566_v7, %v550_v6  ;;  %v598_v16 = vmul.f32 %v566_v7, %v566_v7  ;;  %v505_v17 = vmul.f32 %v798_v20, %v798_v20 }
 0x140   :  { %v623_v18 = vadd.f32 %v607_v9, %v591_v8  ;;  %v590_v19 = vadd.f32 %v574_v13, %v558_v10  ;;  %v606_v21 = vmul.f32 %v574_v13, %v574_v13  ;;  %v513_v11 = vmul.f32 %v800_v36, %v800_v36 }
 0x141   :  { %631 = vst [vmem:[%s1102_s5 + $0x28] sm:$0xff] %v615_v14  ;;  %v614_v22 = vadd.f32 %v598_v16, %v582_v15  ;;  %v521_v12 = vadd.f32 %v798_v20, %v505_v17  ;;  %v537_v23 = vmul.f32 %v505_v17, %v505_v17  ;;  %v504_v60 = vmul.f32 %v802_v42, %v802_v42 }
 0x142   :  { %639 = vst [vmem:[%s1102_s5 + $0x68] sm:$0xff] %v623_v18  ;;  %v622_v24 = vadd.f32 %v606_v21, %v590_v19  ;;  %v529_v25 = vadd.f32 %v800_v36, %v513_v11  ;;  %v545_v26 = vmul.f32 %v513_v11, %v513_v11  ;;  %v494_v27 = vmul.f32 1.442695, %v1046_v39 }
 0x143   :  { %630 = vst [vmem:[%s1102_s5 + $0x20] sm:$0xff] %v614_v22  ;;  %v553_v28 = vadd.f32 %v537_v23, %v521_v12  ;;  %v569_v29 = vmul.f32 %v537_v23, %v537_v23  ;;  %v520_v30 = vadd.f32 %v802_v42, %v504_v60  ;;  %v536_v31 = vmul.f32 %v504_v60, %v504_v60 }
 0x144   :  { %638 = vst [vmem:[%s1102_s5 + $0x60] sm:$0xff] %v622_v24  ;;  %v561_v20 = vadd.f32 %v545_v26, %v529_v25  ;;  %v577_v32 = vmul.f32 %v545_v26, %v545_v26  ;;  %803 = vpow2.f32 %v494_v27 }
 0x145   :  { %v585_v33 = vadd.f32 %v569_v29, %v553_v28  ;;  %v601_v34 = vmul.f32 %v569_v29, %v569_v29  ;;  %v552_v35 = vadd.f32 %v536_v31, %v520_v30  ;;  %v568_v36 = vmul.f32 %v536_v31, %v536_v31 }
 0x146   :  { %v593_v39 = vadd.f32 %v577_v32, %v561_v20  ;;  %v609_v37 = vmul.f32 %v577_v32, %v577_v32 }
 0x147   :  { %v617_v38 = vadd.f32 %v601_v34, %v585_v33  ;;  %v584_v40 = vadd.f32 %v568_v36, %v552_v35  ;;  %v600_v41 = vmul.f32 %v568_v36, %v568_v36 }
 0x148   :  { %v625_v43 = vadd.f32 %v609_v37, %v593_v39 }
 0x149   :  { %633 = vst [vmem:[%s1102_s5 + $0x38] sm:$0xff] %v617_v38  ;;  %v616_v42 = vadd.f32 %v600_v41, %v584_v40 }
 0x14a   :  { %641 = vst [vmem:[%s1102_s5 + $0x78] sm:$0xff] %v625_v43 }
 0x14b   :  { %632 = vst [vmem:[%s1102_s5 + $0x30] sm:$0xff] %v616_v42 }
 0x151   :  { %v804_v44 = vpop.eup %803 }
 0x152   :  { %v512_v45 = vmul.f32 %v804_v44, %v804_v44 }
 0x154   :  { %v528_v46 = vadd.f32 %v804_v44, %v512_v45  ;;  %v544_v47 = vmul.f32 %v512_v45, %v512_v45 }
 0x156   :  { %v560_v48 = vadd.f32 %v544_v47, %v528_v46  ;;  %v576_v49 = vmul.f32 %v544_v47, %v544_v47 }
 0x158   :  { %v592_v50 = vadd.f32 %v576_v49, %v560_v48  ;;  %v608_v51 = vmul.f32 %v576_v49, %v576_v49 }
 0x15a   :  { %v624_v52 = vadd.f32 %v608_v51, %v592_v50 }
 0x15c   :  { %640 = vst [vmem:[%s1102_s5 + $0x70] sm:$0xff] %v624_v52 }
 0x15d   :  { %646 = vsyncpa [#allocation4], 1 }

</bundles_post_ra>
